<compile_context>
chip_gen: v7x
topology: tpu7x:2x2x1
jax: 0.10.0
libtpu: 0.0.40
codegen_flags: <defaults>
</compile_context>

<pallas_src>
import jax
import jax.numpy as jnp
from jax.experimental import pallas as pl
from jax.experimental.pallas import tpu as pltpu


def _general_attn_kernel(u_ref, enc_ref, out_ref):
    # u_ref:   (8, B*H)       (hidden @ W) flattened, replicated over sublanes
    # enc_ref: (TILE_S, B*H)  lane-dense tile of encoder outputs along S
    # out_ref: (8, TILE_S)    raw attention scores for this tile (rows identical)
    out_ref[...] = jax.lax.dot_general(
        u_ref[...], enc_ref[...],
        dimension_numbers=(((1,), (1,)), ((), ())),
        preferred_element_type=jnp.float32)


def _vmem_capacity_bytes():
    """Physical VMEM of the local TPU generation, with a conservative fallback."""
    try:
        info = pltpu.get_tpu_info()
        for attr in ("vmem_capacity_bytes", "vmem_size_bytes", "vmem_bytes"):
            v = getattr(info, attr, None)
            if isinstance(v, int) and v > 0:
                return v
    except Exception:
        pass
    return 64 * 1024 * 1024  # v7x per-TensorCore VMEM (smallest across gens)


def _choose_tile_s(S, row_bytes, per_buffer_budget):
    """Rows per enc tile: biggest budget-fitting tile, preferring exact
    multiple-of-128 divisors of S (lane-dense stores, no tail padding)."""
    max_rows = max(8, per_buffer_budget // max(row_bytes, 1))
    if S <= max_rows:
        return S                              # single tile spans the sequence
    max_rows_128 = max(128, (max_rows // 128) * 128)
    if S % 128 == 0:
        s128 = S // 128
        for k in range(min(s128, max_rows_128 // 128), 0, -1):
            if s128 % k == 0:
                return 128 * k
    return max_rows_128                       # no friendly divisor: pad the tail


def general_attn_forward(encoder_outputs, hidden, w, b=None, *, tile_s=None):
    """GeneralAttn(method='general').forward.

    encoder_outputs: (S, B, H) f32
    hidden:          (1, B, H) f32   (n_layers * n_directions == 1)
    w:               (H, H)    f32   nn.Linear weight (out_features, in_features)
    b:               (H,)      f32   nn.Linear bias (constant score shift over s;
                                     cancels in the full-sequence softmax)
    returns:         (1, 1, S) f32 == F.softmax(att_scores).unsqueeze(0).unsqueeze(0)
    """
    del b  # constant shift of every score -> identical softmax output
    S, B, H = encoder_outputs.shape
    BH = B * H

    # Hoisted out of the grid loop: u[b,j] = sum_k hidden[b,k] * W[k,j].
    u = jnp.dot(hidden.reshape(B, H), w,
                preferred_element_type=jnp.float32).reshape(1, BH)
    # Replicate over 8 sublanes so the per-tile dot produces a full, unmasked
    # (8, TILE_S) store (MXU cost is identical to a single row).
    u8 = jnp.broadcast_to(u, (8, BH)).astype(jnp.float32)

    # Layout plumbing only: contiguous reshape, no broadcast / pooling matrix.
    enc2 = encoder_outputs.reshape(S, BH)

    # Generation-aware tiling: per-buffer budget derived from VMEM capacity,
    # accounting for the x2 double buffering BlockSpec adds.
    vmem_cap = _vmem_capacity_bytes()
    per_buffer_budget = min(vmem_cap // 4, 32 << 20)
    if tile_s is None:
        tile_s = _choose_tile_s(S, BH * 4, per_buffer_budget)
    tile_s = int(min(tile_s, S))
    if tile_s < S:
        tile_s = max(8, (tile_s // 8) * 8)    # sublane-aligned when tiling

    num_tiles = -(-S // tile_s)
    s_pad = num_tiles * tile_s
    if s_pad != S:
        enc2 = jnp.pad(enc2, ((0, s_pad - S), (0, 0)))

    enc_block_bytes = tile_s * BH * 4
    out_block_bytes = 8 * tile_s * 4
    need = 2 * (enc_block_bytes + out_block_bytes + 8 * BH * 4) + (4 << 20)
    vmem_limit = int(min(vmem_cap, max(need, 32 << 20)))

    raw = pl.pallas_call(
        _general_attn_kernel,
        grid=(num_tiles,),
        in_specs=[
            pl.BlockSpec((8, BH), lambda i: (0, 0)),          # u  (resident)
            pl.BlockSpec((tile_s, BH), lambda i: (i, 0)),     # enc tile (pipelined)
        ],
        out_specs=pl.BlockSpec((8, tile_s), lambda i: (0, i)),
        out_shape=jax.ShapeDtypeStruct((8, s_pad), jnp.float32),
        compiler_params=pltpu.CompilerParams(
            dimension_semantics=("parallel",),   # independent tiles: both TCs on v7x
            vmem_limit_bytes=vmem_limit),
    )(u8, enc2)

    scores = raw[0, :S]                          # drop padded tail (if any)
    return jax.nn.softmax(scores).reshape(1, 1, S)


def _reference(encoder_outputs, hidden, w, b):
    # Pure-JAX reference matching the PyTorch forward (bias included).
    att = jnp.einsum('sbj,kj->sbk', encoder_outputs, w) + b     # Linear per (s, b)
    scores = jnp.einsum('sbk,bk->s', att, hidden[0])            # flattened dot per s
    return jax.nn.softmax(scores)[None, None, :]                # (1, 1, S)


if __name__ == "__main__":
    key = jax.random.PRNGKey(0)

    def run_case(S, B, H, tile_s=None):
        k1, k2, k3, k4 = jax.random.split(jax.random.fold_in(key, S), 4)
        enc = jax.random.normal(k1, (S, B, H), dtype=jnp.float32)
        hid = jax.random.normal(k2, (1, B, H), dtype=jnp.float32)
        bound = 1.0 / (H ** 0.5)
        w = jax.random.uniform(k3, (H, H), minval=-bound, maxval=bound,
                               dtype=jnp.float32)
        b = jax.random.uniform(k4, (H,), minval=-bound, maxval=bound,
                               dtype=jnp.float32)
        out = general_attn_forward(enc, hid, w, b, tile_s=tile_s)
        out = jax.block_until_ready(out)
        ref = _reference(enc, hid, w, b)
        assert out.shape == (1, 1, S), out.shape
        assert jnp.allclose(out, ref, atol=1e-5, rtol=1e-5), (out, ref)

    run_case(8, 2, 32)                    # single tile  (NT == 1)
    run_case(256, 2, 32, tile_s=128)      # multi-tile, no padding  (NT == 2)
    run_case(320, 2, 32, tile_s=128)      # multi-tile + padded tail (NT == 3)
    print("KERNEL_OK")
</pallas_src>

<mosaic_0001>
module attributes {stable_mosaic.version = 11 : i64} {
  func.func @_general_attn_kernel(%arg0: i32, %arg1: memref<8x64xf32, #tpu.memory_space<vmem>>, %arg2: memref<8x64xf32, #tpu.memory_space<vmem>>, %arg3: memref<8x8xf32, #tpu.memory_space<vmem>>) attributes {dimension_semantics = [#tpu.dimension_semantics<parallel>], iteration_bounds = array<i64: 1>, scalar_prefetch = 0 : i64, scratch_operands = 0 : i64, tpu.core_type = #tpu.core_type<tc>, window_params = [{pipeline_mode = #tpu.pipeline_mode<synchronous>, transform_indices = @transform_0, window_bounds = array<i64: 8, 64>}, {transform_indices = @transform_1, window_bounds = array<i64: 8, 64>}, {transform_indices = @transform_2, window_bounds = array<i64: 8, 8>}]} {
    %c0 = arith.constant 0 : index
    %c0_0 = arith.constant 0 : index
    %0 = vector.load %arg1[%c0, %c0_0] : memref<8x64xf32, #tpu.memory_space<vmem>>, vector<8x64xf32>
    %c0_1 = arith.constant 0 : index
    %c0_2 = arith.constant 0 : index
    %1 = vector.load %arg2[%c0_1, %c0_2] : memref<8x64xf32, #tpu.memory_space<vmem>>, vector<8x64xf32>
    %cst = arith.constant dense<0.000000e+00> : vector<8x8xf32>
    %2 = tpu.matmul %0, %1, %cst {dimension_numbers = #tpu.dot_dimension_numbers<[1], [1], [0], [0], [0, 0, 1, 0], [], []>} : vector<8x64xf32>, vector<8x64xf32>, vector<8x8xf32> -> vector<8x8xf32>
    %c0_3 = arith.constant 0 : index
    %c0_4 = arith.constant 0 : index
    %3 = vector.load %arg3[%c0_3, %c0_4] : memref<8x8xf32, #tpu.memory_space<vmem>>, vector<8x8xf32>
    tpu.vector_store %arg3[%c0_3, %c0_4], %2 {strides = array<i32>} : memref<8x8xf32, #tpu.memory_space<vmem>>, vector<8x8xf32>,
    return
  }
  func.func @transform_0(%arg0: i32) -> (i32, i32) {
    %c0_i32 = arith.constant 0 : i32
    %c0_i32_0 = arith.constant 0 : i32
    %c0_i32_1 = arith.constant 0 : i32
    return %c0_i32, %c0_i32_0 : i32, i32
  }
  func.func @transform_1(%arg0: i32) -> (i32, i32) {
    %c0_i32 = arith.constant 0 : i32
    %c0_i32_0 = arith.constant 0 : i32
    return %arg0, %c0_i32 : i32, i32
  }
  func.func @transform_2(%arg0: i32) -> (i32, i32) {
    %c0_i32 = arith.constant 0 : i32
    %c0_i32_0 = arith.constant 0 : i32
    return %c0_i32, %arg0 : i32, i32
  }
}

</mosaic_0001>

<bundles_post_ra>
// kernel: tpu_custom_call.1
= control target key start
LH: loop header
LB: loop body
LE: loop exit
PB: predicated region body
PF: predicated region fallthrough
CT: control target
= control target key end

     0   :  { %7 = vsyncpa [#allocation3], 0  ;;  %s275_s0 = inlined_call_operand.hbm [shape: f32[8,64], index: 0, kind: input, shape index: {}]   ;;  %s276_s1 = inlined_call_operand.hbm [shape: f32[8,64], index: 1, kind: input, shape index: {}]   ;;  %s277_s2 = inlined_call_operand.hbm [shape: f32[8,8], index: 2, kind: output, shape index: {}]  }
   0x1   :  { %8 = vsyncpa [#allocation6], 0 }
   0x2   :  { %9 = vsyncpa [#allocation4], 0  ;;  %s219_s9 = smov [#allocation2]   ;;  %s220_s11 = smov [#allocation5]  }
   0x3   :  { %s16_s10 = sshll.u32 %s219_s9, 4  ;;  %s26_s12 = sshll.u32 %s220_s11, 4  ;;  %s17_s10 = int_to_ptr.vmem [resolvable:$true] %s16_s10  ;;  %s27_s12 = int_to_ptr.vmem [resolvable:$true] %s26_s12 }
   0x4   :  { %s147_s15 = scalar_lea.hbm %s275_s0, 128 }
   0x5   :  { %p148_p0 = scmp.ne.s32.totalorder %s275_s0, %s147_s15  ;;  %p151_p1 = scmp.lt.u32.totalorder %s147_s15, %s275_s0 }
   0x7   :  { %p153_p2 = pnand %p151_p1, %p148_p0 }
   0x9   :  { %156 = shalt.err (!%p153_p2)
}
   0xa   :  { %s157_s20 = scalar_lea.vmem %s17_s10, 128  ;;  %p162_p4 = scmp.lt.s32.totalorder %s17_s10, %s17_s10 }
   0xb   :  { %p158_p3 = scmp.ne.s32.totalorder %s17_s10, %s157_s20  ;;  %p163_p5 = scmp.lt.s32.totalorder %s157_s20, %s157_s20 }
   0xd   :  { %p164_p6 = por %p163_p5, %p162_p4 }
   0xf   :  { %p165_p7 = pnand %p164_p6, %p158_p3 }
  0x11   :  { %168 = shalt.err (!%p165_p7)
}
  0x12   :  { %19 = dma.hbm_to_vmem [thread:$0]  %s275_s0, 128, %s17_s10, [#allocation3]  }
  0x13   :  { %s169_s25 = scalar_lea.hbm %s276_s1, 128 }
  0x14   :  { %p170_p8 = scmp.ne.s32.totalorder %s276_s1, %s169_s25  ;;  %p173_p9 = scmp.lt.u32.totalorder %s169_s25, %s276_s1 }
  0x16   :  { %p175_p10 = pnand %p173_p9, %p170_p8 }
  0x18   :  { %178 = shalt.err (!%p175_p10)
}
  0x19   :  { %s179_s30 = scalar_lea.vmem %s27_s12, 128  ;;  %p184_p12 = scmp.lt.s32.totalorder %s27_s12, %s27_s12 }
  0x1a   :  { %p180_p11 = scmp.ne.s32.totalorder %s27_s12, %s179_s30  ;;  %p185_p13 = scmp.lt.s32.totalorder %s179_s30, %s179_s30 }
  0x1c   :  { %p186_p0 = por %p185_p13, %p184_p12 }
  0x1e   :  { %p187_p1 = pnand %p186_p0, %p180_p11 }
  0x20   :  { %190 = shalt.err (!%p187_p1)
}
  0x21   :  { %29 = dma.hbm_to_vmem [thread:$0]  %s276_s1, 128, %s27_s12, [#allocation6]  }
  0x22   :  { %213 = dma.done.wait [#allocation3], 128  }
  0x23   :  { %214 = vsyncadd [#allocation3], 4294967168 }
  0x24   :  { %215 = dma.done.wait [#allocation6], 128  }
  0x25   :  { %216 = vsyncadd [#allocation6], 4294967168  ;;  %v221_v0 = vmov 0.0   ;;  %vm222_vm0 = vmmov 0   ;;  %vm38_vm1 = vcmask 523264   ;;  %v37_v1 = vld [vmem:[#allocation5] sm:$0xff] }
  0x26   :  { %137 = vmatprep.subr.mxu0 %v221_v0  ;;  %139 = vmatprep.mubr.msk.f32.mxu0 %vm222_vm0, %v221_v0  ;;  %v36_v2 = vld [vmem:[#allocation2] sm:$0xff]  ;;  %s223_s4 = smov [#allocation7]   ;;  %vm115_vm2 = vcmask 64512  }
  0x27   :  { %138 = vmatpush3.xpose.msk.msra.mxu0 %vm38_vm1, %v37_v1  ;;  %s123_s5 = sshll.u32 %s223_s4, 4  ;;  %s124_s5 = int_to_ptr.vmem [resolvable:$true] %s123_s5 }
  0x28   :  { %s191_s1 = scalar_lea.vmem %s124_s5, 128  ;;  %p196_p3 = scmp.lt.s32.totalorder %s124_s5, %s124_s5 }
  0x29   :  { %p192_p2 = scmp.ne.s32.totalorder %s124_s5, %s191_s1  ;;  %p197_p4 = scmp.lt.s32.totalorder %s191_s1, %s191_s1 }
  0x2a   :  { %140 = vmatmul.mubr.msk.f32.vlgmr.msra.gmra.mrb[0].mxu0 %vm38_vm1, %v36_v2 }
  0x2b   :  { %p198_p5 = por %p197_p4, %p196_p3 }
  0x2d   :  { %p199_p6 = pnand %p198_p5, %p192_p2 }
  0xfd   :  { %v111_v3 = vpop.f32.mrb[0].mxu0 }
  0xfe   :  { %v141_v4 = vpop.f32.mrb[1].mxu0  ;;  %116 = vst.msk [vmem:[#allocation7] sm:$0xff] %vm115_vm2, %v111_v3 }
  0xff   :  { %202 = shalt.err (!%p199_p6)
}
 0x100   :  { %s203_s8 = scalar_lea.hbm %s277_s2, 128 }
 0x101   :  { %p204_p7 = scmp.ne.s32.totalorder %s277_s2, %s203_s8  ;;  %p207_p8 = scmp.lt.u32.totalorder %s203_s8, %s277_s2 }
 0x103   :  { %p209_p9 = pnand %p207_p8, %p204_p7 }
 0x105   :  { %212 = shalt.err (!%p209_p9)
}
 0x106   :  { %126 = dma.vmem_to_hbm [thread:$0]  %s124_s5, 128, %s277_s2, [#allocation4]  }
 0x107   :  { %217 = dma.done.wait [#allocation4], 128  }
 0x108   :  { %218 = vsyncadd [#allocation4], 4294967168 }
 0x109   :  { %130 = vsyncpa [#allocation3], 1 }
 0x10a   :  { %131 = vsyncpa [#allocation6], 1 }
 0x10b   :  { %132 = vsyncpa [#allocation4], 1 }

</bundles_post_ra>
